<compile_context>
chip_gen: v7x
topology: tpu7x:2x2x1
jax: 0.10.0
libtpu: 0.0.40
codegen_flags: <defaults>
</compile_context>

<pallas_src>
import functools

import jax
import jax.numpy as jnp
from jax.experimental import pallas as pl
from jax.experimental.pallas import tpu as pltpu

LANE = 128


def _round_up(n: int, m: int) -> int:
    return ((n + m - 1) // m) * m


def _cdiv(a: int, b: int) -> int:
    return -(-a // b)


# ---------------------------------------------------------------------------
# Kernel: kernel(x, A1, ..., AL, out).  Each A is the bias-augmented, padded
# weight, so a layer is exactly one MXU matmul (+ ReLU for hidden layers).
# ---------------------------------------------------------------------------
def _fused_mlp_kernel(x_ref, *refs, n_layers: int, compute_dtype):
    o_ref = refs[-1]
    ws = refs[:-1]
    h = x_ref[...]
    for idx in range(n_layers):
        # MXU matmul with f32 accumulation regardless of operand dtype.
        h = jnp.dot(h, ws[idx][...], preferred_element_type=jnp.float32)
        if idx < n_layers - 1:
            # ReLU, then back to the compute dtype for the next MXU pass.
            h = jnp.maximum(h, 0.0).astype(compute_dtype)
    o_ref[...] = h.astype(o_ref.dtype)


# ---------------------------------------------------------------------------
# Parameter construction / preparation (done ONCE, at init).
# ---------------------------------------------------------------------------
def init_mlp_params(sizes, key):
    """Kaiming-normal weights (std = sqrt(2/fan_in)), zero biases.

    Mirrors source_model.init_weights(); weights stored (in, out), unpadded.
    """
    params = []
    for i in range(len(sizes) - 1):
        fan_in, fan_out = sizes[i], sizes[i + 1]
        key, sub = jax.random.split(key)
        w = jax.random.normal(sub, (fan_in, fan_out), dtype=jnp.float32) * jnp.sqrt(
            2.0 / fan_in
        )
        b = jnp.zeros((fan_out,), dtype=jnp.float32)
        params.append((w, b))
    return params


def prepare_params(params, compute_dtype=jnp.bfloat16, lane=LANE):
    """Fold bias into an augmented weight + pad every dim to a multiple of 128.

    Layer i's augmented weight A_i (shape (p_{i-1}, p_i)):
      * A_i[:din, :dout]   = W_i
      * A_i[din,  :dout]   = b_i           (bias row, driven by the ones column)
      * A_i[din,  dout]    = 1.0 (hidden layers only; propagates the ones
                                  feature: ReLU(1) = 1)
    All other padded entries are zero, so padded lanes stay exactly zero
    through every layer (ReLU(0) = 0).  Call this ONCE at init.
    """
    n = len(params)
    aug = []
    for i, (w, b) in enumerate(params):
        din, dout = w.shape
        last = i == n - 1
        din_p = _round_up(din + 1, lane)                       # +1: ones slot
        dout_p = _round_up(dout + (0 if last else 1), lane)
        a = jnp.zeros((din_p, dout_p), jnp.float32)
        a = a.at[:din, :dout].set(w)
        a = a.at[din, :dout].set(jnp.reshape(b, (-1,)))        # bias row
        if not last:
            a = a.at[din, dout].set(1.0)                       # propagate ones
        aug.append(a.astype(compute_dtype))
    return aug


# ---------------------------------------------------------------------------
# Forward pass: one fused pallas_call.
# ---------------------------------------------------------------------------
def fused_mlp_forward(x, aug_weights, out_dim, *, block_batch: int = 512):
    """x: (B, Din) unpadded.  aug_weights: output of prepare_params().

    Returns (B, out_dim) in x.dtype.  (For repeated use, wrap in jax.jit so the
    padding/slicing fuses and launch overhead amortizes.)
    """
    n_layers = len(aug_weights)
    B, din = x.shape
    din_p = aug_weights[0].shape[0]
    dout_p = aug_weights[-1].shape[1]
    cdt = aug_weights[0].dtype
    out_dtype = x.dtype

    # Sublane packing: 16 rows per tile for bf16, 8 for f32.
    sub = max(8, 32 // cdt.itemsize)

    # Adaptive batch tiling: large tiles amortize the ~0.35 us per-grid-step
    # overhead, but the tile is shrunk to ceil(B / num_tiles) so a batch just
    # past a boundary is not padded ~2x.  Moderately large single-tile batches
    # are split in two so both TensorCores get work on megacore parts (v7x).
    num_tiles = _cdiv(B, block_batch)
    if num_tiles == 1 and B >= 256:
        num_tiles = 2
    tb = _round_up(_cdiv(B, num_tiles), sub)
    b_pad = tb * num_tiles

    # Pad x lane/tile-dense and install the constant-1 ones feature.
    x_p = jnp.zeros((b_pad, din_p), cdt)
    x_p = x_p.at[:B, :din].set(x.astype(cdt))
    x_p = x_p.at[:, din].set(1.0)

    # Explicit VMEM budget: resident weights + double-buffered x/out tiles
    # + slack for in-kernel intermediates.  Keeps v5e's 16 MiB scoped default
    # from biting at larger hidden sizes; capped at v7x-safe 64 MiB.
    w_bytes = sum(a.size * a.dtype.itemsize for a in aug_weights)
    io_bytes = tb * din_p * cdt.itemsize + tb * dout_p * jnp.dtype(out_dtype).itemsize
    vmem_needed = 2 * (w_bytes + io_bytes) + 2 * tb * max(din_p, dout_p) * 4 + (1 << 20)
    vmem_limit = int(min(64 << 20, max(32 << 20, vmem_needed)))

    # Advisory cost hint for XLA's scheduler.
    flops = 2 * b_pad * sum(a.shape[0] * a.shape[1] for a in aug_weights)
    bytes_accessed = (
        x_p.size * x_p.dtype.itemsize
        + w_bytes
        + b_pad * dout_p * jnp.dtype(out_dtype).itemsize
    )

    kernel = functools.partial(
        _fused_mlp_kernel, n_layers=n_layers, compute_dtype=cdt
    )

    def call(single_buffer_weights: bool):
        in_specs = [pl.BlockSpec((tb, din_p), lambda i: (i, 0))]
        for a in aug_weights:
            if single_buffer_weights:
                # Resident block (constant index_map): second pipeline buffer
                # would be dead VMEM.
                spec = pl.BlockSpec(
                    a.shape, lambda i: (0, 0), pipeline_mode=pl.Buffered(1)
                )
            else:
                spec = pl.BlockSpec(a.shape, lambda i: (0, 0))
            in_specs.append(spec)
        return pl.pallas_call(
            kernel,
            out_shape=jax.ShapeDtypeStruct((b_pad, dout_p), out_dtype),
            grid=(num_tiles,),
            in_specs=in_specs,
            out_specs=pl.BlockSpec((tb, dout_p), lambda i: (i, 0)),
            compiler_params=pltpu.CompilerParams(
                dimension_semantics=("parallel",),
                vmem_limit_bytes=vmem_limit,
            ),
            cost_estimate=pl.CostEstimate(
                flops=flops, transcendentals=0, bytes_accessed=bytes_accessed
            ),
        )(x_p, *aug_weights)

    try:
        out_p = call(True)
    except Exception:
        # Fallback if this jax build rejects pipeline_mode / pl.Buffered(1);
        # default double-buffering of the (tiny, resident) weights is harmless.
        out_p = call(False)

    return out_p[:B, :out_dim]


# ---------------------------------------------------------------------------
# Demo / correctness check.
# ---------------------------------------------------------------------------
if __name__ == "__main__":
    # sizes: input -> hidden -> hidden -> output (matches the nn.Linear chain).
    sizes = [32, 64, 48, 16]
    batch = 8
    out_dim = sizes[-1]

    key = jax.random.PRNGKey(0)
    key, xkey = jax.random.split(key)
    x = jax.random.normal(xkey, (batch, sizes[0]), dtype=jnp.float32)

    params = init_mlp_params(sizes, key)

    # Pure-JAX reference of the same math (f32, unpadded).
    ref = x
    for i, (w, b) in enumerate(params):
        ref = ref @ w + b
        if i < len(params) - 1:
            ref = jnp.maximum(ref, 0.0)

    # (1) Exact-math check: f32 operands through the same fused kernel.
    aug_f32 = prepare_params(params, compute_dtype=jnp.float32)
    out_f32 = jax.block_until_ready(fused_mlp_forward(x, aug_f32, out_dim))
    assert out_f32.shape == (batch, out_dim), out_f32.shape
    assert jnp.allclose(out_f32, ref, atol=1e-5, rtol=1e-5)

    # (2) Production path: bf16 operands, f32 MXU accumulation (v6e/v7x native).
    aug_bf16 = prepare_params(params, compute_dtype=jnp.bfloat16)
    out_bf16 = jax.block_until_ready(fused_mlp_forward(x, aug_bf16, out_dim))
    assert out_bf16.shape == (batch, out_dim), out_bf16.shape
    assert jnp.allclose(out_bf16, ref, atol=5e-2, rtol=5e-2)

    print("KERNEL_OK")
</pallas_src>

<mosaic_0001>
module attributes {stable_mosaic.version = 11 : i64} {
  func.func @_fused_mlp_kernel(%arg0: i32, %arg1: memref<8x128xf32, #tpu.memory_space<vmem>>, %arg2: memref<128x128xf32, #tpu.memory_space<vmem>>, %arg3: memref<128x128xf32, #tpu.memory_space<vmem>>, %arg4: memref<128x128xf32, #tpu.memory_space<vmem>>, %arg5: memref<8x128xf32, #tpu.memory_space<vmem>>) attributes {dimension_semantics = [#tpu.dimension_semantics<parallel>], iteration_bounds = array<i64: 1>, scalar_prefetch = 0 : i64, scratch_operands = 0 : i64, tpu.core_type = #tpu.core_type<tc>, window_params = [{transform_indices = @transform_0, window_bounds = array<i64: 8, 128>}, {pipeline_mode = #tpu.pipeline_mode<synchronous>, transform_indices = @transform_1, window_bounds = array<i64: 128, 128>}, {pipeline_mode = #tpu.pipeline_mode<synchronous>, transform_indices = @transform_2, window_bounds = array<i64: 128, 128>}, {pipeline_mode = #tpu.pipeline_mode<synchronous>, transform_indices = @transform_3, window_bounds = array<i64: 128, 128>}, {transform_indices = @transform_4, window_bounds = array<i64: 8, 128>}]} {
    %c0 = arith.constant 0 : index
    %c0_0 = arith.constant 0 : index
    %0 = vector.load %arg1[%c0, %c0_0] : memref<8x128xf32, #tpu.memory_space<vmem>>, vector<8x128xf32>
    %c0_1 = arith.constant 0 : index
    %c0_2 = arith.constant 0 : index
    %1 = vector.load %arg2[%c0_1, %c0_2] : memref<128x128xf32, #tpu.memory_space<vmem>>, vector<128x128xf32>
    %cst = arith.constant dense<0.000000e+00> : vector<8x128xf32>
    %2 = tpu.matmul %0, %1, %cst {dimension_numbers = #tpu.dot_dimension_numbers<[1], [0], [0], [1], [0, 0, 1, 1], [], []>} : vector<8x128xf32>, vector<128x128xf32>, vector<8x128xf32> -> vector<8x128xf32>
    %cst_3 = arith.constant 0.000000e+00 : f32
    %3 = vector.broadcast %cst_3 : f32 to vector<8x128xf32>
    %4 = arith.maximumf %2, %3 : vector<8x128xf32>
    %c0_4 = arith.constant 0 : index
    %c0_5 = arith.constant 0 : index
    %5 = vector.load %arg3[%c0_4, %c0_5] : memref<128x128xf32, #tpu.memory_space<vmem>>, vector<128x128xf32>
    %cst_6 = arith.constant dense<0.000000e+00> : vector<8x128xf32>
    %6 = tpu.matmul %4, %5, %cst_6 {dimension_numbers = #tpu.dot_dimension_numbers<[1], [0], [0], [1], [0, 0, 1, 1], [], []>} : vector<8x128xf32>, vector<128x128xf32>, vector<8x128xf32> -> vector<8x128xf32>
    %cst_7 = arith.constant 0.000000e+00 : f32
    %7 = vector.broadcast %cst_7 : f32 to vector<8x128xf32>
    %8 = arith.maximumf %6, %7 : vector<8x128xf32>
    %c0_8 = arith.constant 0 : index
    %c0_9 = arith.constant 0 : index
    %9 = vector.load %arg4[%c0_8, %c0_9] : memref<128x128xf32, #tpu.memory_space<vmem>>, vector<128x128xf32>
    %cst_10 = arith.constant dense<0.000000e+00> : vector<8x128xf32>
    %10 = tpu.matmul %8, %9, %cst_10 {dimension_numbers = #tpu.dot_dimension_numbers<[1], [0], [0], [1], [0, 0, 1, 1], [], []>} : vector<8x128xf32>, vector<128x128xf32>, vector<8x128xf32> -> vector<8x128xf32>
    %c0_11 = arith.constant 0 : index
    %c0_12 = arith.constant 0 : index
    %11 = vector.load %arg5[%c0_11, %c0_12] : memref<8x128xf32, #tpu.memory_space<vmem>>, vector<8x128xf32>
    tpu.vector_store %arg5[%c0_11, %c0_12], %10 {strides = array<i32>} : memref<8x128xf32, #tpu.memory_space<vmem>>, vector<8x128xf32>,
    return
  }
  func.func @transform_0(%arg0: i32) -> (i32, i32) {
    %c0_i32 = arith.constant 0 : i32
    %c0_i32_0 = arith.constant 0 : i32
    return %arg0, %c0_i32 : i32, i32
  }
  func.func @transform_1(%arg0: i32) -> (i32, i32) {
    %c0_i32 = arith.constant 0 : i32
    %c0_i32_0 = arith.constant 0 : i32
    %c0_i32_1 = arith.constant 0 : i32
    return %c0_i32, %c0_i32_0 : i32, i32
  }
  func.func @transform_2(%arg0: i32) -> (i32, i32) {
    %c0_i32 = arith.constant 0 : i32
    %c0_i32_0 = arith.constant 0 : i32
    %c0_i32_1 = arith.constant 0 : i32
    return %c0_i32, %c0_i32_0 : i32, i32
  }
  func.func @transform_3(%arg0: i32) -> (i32, i32) {
    %c0_i32 = arith.constant 0 : i32
    %c0_i32_0 = arith.constant 0 : i32
    %c0_i32_1 = arith.constant 0 : i32
    return %c0_i32, %c0_i32_0 : i32, i32
  }
  func.func @transform_4(%arg0: i32) -> (i32, i32) {
    %c0_i32 = arith.constant 0 : i32
    %c0_i32_0 = arith.constant 0 : i32
    return %arg0, %c0_i32 : i32, i32
  }
}

module attributes {stable_mosaic.version = 11 : i64} {
  func.func @_fused_mlp_kernel(%arg0: i32, %arg1: memref<8x128xf32, #tpu.memory_space<vmem>>, %arg2: memref<128x128xf32, #tpu.memory_space<vmem>>, %arg3: memref<128x128xf32, #tpu.memory_space<vmem>>, %arg4: memref<128x128xf32, #tpu.memory_space<vmem>>, %arg5: memref<8x128xf32, #tpu.memory_space<vmem>>) attributes {dimension_semantics = [#tpu.dimension_semantics<parallel>], iteration_bounds = array<i64: 1>, scalar_prefetch = 0 : i64, scratch_operands = 0 : i64, tpu.core_type = #tpu.core_type<tc>, window_params = [{transform_indices = @transform_0, window_bounds = array<i64: 8, 128>}, {pipeline_mode = #tpu.pipeline_mode<synchronous>, transform_indices = @transform_1, window_bounds = array<i64: 128, 128>}, {pipeline_mode = #tpu.pipeline_mode<synchronous>, transform_indices = @transform_2, window_bounds = array<i64: 128, 128>}, {pipeline_mode = #tpu.pipeline_mode<synchronous>, transform_indices = @transform_3, window_bounds = array<i64: 128, 128>}, {transform_indices = @transform_4, window_bounds = array<i64: 8, 128>}]} {
    %c0 = arith.constant 0 : index
    %c0_0 = arith.constant 0 : index
    %0 = vector.load %arg1[%c0, %c0_0] : memref<8x128xf32, #tpu.memory_space<vmem>>, vector<8x128xf32>
    %c0_1 = arith.constant 0 : index
    %c0_2 = arith.constant 0 : index
    %1 = vector.load %arg2[%c0_1, %c0_2] : memref<128x128xf32, #tpu.memory_space<vmem>>, vector<128x128xf32>
    %cst = arith.constant dense<0.000000e+00> : vector<8x128xf32>
    %2 = tpu.matmul %0, %1, %cst {dimension_numbers = #tpu.dot_dimension_numbers<[1], [0], [0], [1], [0, 0, 1, 1], [], []>} : vector<8x128xf32>, vector<128x128xf32>, vector<8x128xf32> -> vector<8x128xf32>
    %cst_3 = arith.constant 0.000000e+00 : f32
    %3 = vector.broadcast %cst_3 : f32 to vector<8x128xf32>
    %4 = arith.maximumf %2, %3 : vector<8x128xf32>
    %c0_4 = arith.constant 0 : index
    %c0_5 = arith.constant 0 : index
    %5 = vector.load %arg3[%c0_4, %c0_5] : memref<128x128xf32, #tpu.memory_space<vmem>>, vector<128x128xf32>
    %cst_6 = arith.constant dense<0.000000e+00> : vector<8x128xf32>
    %6 = tpu.matmul %4, %5, %cst_6 {dimension_numbers = #tpu.dot_dimension_numbers<[1], [0], [0], [1], [0, 0, 1, 1], [], []>} : vector<8x128xf32>, vector<128x128xf32>, vector<8x128xf32> -> vector<8x128xf32>
    %cst_7 = arith.constant 0.000000e+00 : f32
    %7 = vector.broadcast %cst_7 : f32 to vector<8x128xf32>
    %8 = arith.maximumf %6, %7 : vector<8x128xf32>
    %c0_8 = arith.constant 0 : index
    %c0_9 = arith.constant 0 : index
    %9 = vector.load %arg4[%c0_8, %c0_9] : memref<128x128xf32, #tpu.memory_space<vmem>>, vector<128x128xf32>
    %cst_10 = arith.constant dense<0.000000e+00> : vector<8x128xf32>
    %10 = tpu.matmul %8, %9, %cst_10 {dimension_numbers = #tpu.dot_dimension_numbers<[1], [0], [0], [1], [0, 0, 1, 1], [], []>} : vector<8x128xf32>, vector<128x128xf32>, vector<8x128xf32> -> vector<8x128xf32>
    %c0_11 = arith.constant 0 : index
    %c0_12 = arith.constant 0 : index
    %11 = vector.load %arg5[%c0_11, %c0_12] : memref<8x128xf32, #tpu.memory_space<vmem>>, vector<8x128xf32>
    tpu.vector_store %arg5[%c0_11, %c0_12], %10 {strides = array<i32>} : memref<8x128xf32, #tpu.memory_space<vmem>>, vector<8x128xf32>,
    return
  }
  func.func @transform_0(%arg0: i32) -> (i32, i32) {
    %c0_i32 = arith.constant 0 : i32
    %c0_i32_0 = arith.constant 0 : i32
    return %arg0, %c0_i32 : i32, i32
  }
  func.func @transform_1(%arg0: i32) -> (i32, i32) {
    %c0_i32 = arith.constant 0 : i32
    %c0_i32_0 = arith.constant 0 : i32
    %c0_i32_1 = arith.constant 0 : i32
    return %c0_i32, %c0_i32_0 : i32, i32
  }
  func.func @transform_2(%arg0: i32) -> (i32, i32) {
    %c0_i32 = arith.constant 0 : i32
    %c0_i32_0 = arith.constant 0 : i32
    %c0_i32_1 = arith.constant 0 : i32
    return %c0_i32, %c0_i32_0 : i32, i32
  }
  func.func @transform_3(%arg0: i32) -> (i32, i32) {
    %c0_i32 = arith.constant 0 : i32
    %c0_i32_0 = arith.constant 0 : i32
    %c0_i32_1 = arith.constant 0 : i32
    return %c0_i32, %c0_i32_0 : i32, i32
  }
  func.func @transform_4(%arg0: i32) -> (i32, i32) {
    %c0_i32 = arith.constant 0 : i32
    %c0_i32_0 = arith.constant 0 : i32
    return %arg0, %c0_i32 : i32, i32
  }
}

</mosaic_0001>

<bundles_post_ra>
// kernel: tpu_custom_call.1
= control target key start
LH: loop header
LB: loop body
LE: loop exit
PB: predicated region body
PF: predicated region fallthrough
CT: control target
= control target key end

     0   :  { %9 = vsyncpa [#allocation3], 0  ;;  %s840_s0 = inlined_call_operand.hbm [shape: f32[8,128], index: 0, kind: input, shape index: {}]   ;;  %s841_s1 = inlined_call_operand.hbm [shape: f32[128,128], index: 1, kind: input, shape index: {}]   ;;  %s842_s2 = inlined_call_operand.hbm [shape: f32[128,128], index: 2, kind: input, shape index: {}]   ;;  %s843_s3 = inlined_call_operand.hbm [shape: f32[128,128], index: 3, kind: input, shape index: {}]   ;;  %s844_s4 = inlined_call_operand.hbm [shape: f32[8,128], index: 4, kind: output, shape index: {}]  }
   0x1   :  { %10 = vsyncpa [#allocation6], 0 }
   0x2   :  { %11 = vsyncpa [#allocation9], 0 }
   0x3   :  { %12 = vsyncpa [#allocation4], 0  ;;  %s706_s15 = smov [#allocation5]   ;;  %s588_s19 = scalar_lea.hbm %s841_s1, 2048 }
   0x4   :  { %s28_s16 = sshll.u32 %s706_s15, 4  ;;  %p589_p0 = scmp.ne.s32.totalorder %s841_s1, %s588_s19  ;;  %s29_s16 = int_to_ptr.vmem [resolvable:$true] %s28_s16 }
   0x5   :  { %p592_p1 = scmp.lt.u32.totalorder %s588_s19, %s841_s1 }
   0x7   :  { %p594_p2 = pnand %p592_p1, %p589_p0 }
   0x9   :  { %597 = shalt.err (!%p594_p2)
}
   0xa   :  { %s598_s24 = scalar_lea.vmem %s29_s16, 2048  ;;  %p603_p4 = scmp.lt.s32.totalorder %s29_s16, %s29_s16 }
   0xb   :  { %p599_p3 = scmp.ne.s32.totalorder %s29_s16, %s598_s24  ;;  %p604_p5 = scmp.lt.s32.totalorder %s598_s24, %s598_s24 }
   0xd   :  { %p605_p6 = por %p604_p5, %p603_p4 }
   0xf   :  { %p606_p7 = pnand %p605_p6, %p599_p3 }
  0x11   :  { %609 = shalt.err (!%p606_p7)
}
  0x12   :  { %s707_s25 = smov 128   ;;  %s708_s26 = smov 8  }
  0x13   :  { %34 = dma.hbm_to_vmem [thread:$0]  %s841_s1, 2048, %s29_s16, [#allocation6], %s707_s25, %s707_s25, %s708_s26  }
  0x14   :  { %s709_s29 = smov [#allocation2]   ;;  %s710_s5 = smov [#allocation7]  }
  0x15   :  { %s19_s30 = sshll.u32 %s709_s29, 4  ;;  %s40_s6 = sshll.u32 %s710_s5, 4  ;;  %s20_s30 = int_to_ptr.vmem [resolvable:$true] %s19_s30  ;;  %s41_s6 = int_to_ptr.vmem [resolvable:$true] %s40_s6 }
  0x16   :  { %s610_s9 = scalar_lea.hbm %s840_s0, 128 }
  0x17   :  { %p611_p8 = scmp.ne.s32.totalorder %s840_s0, %s610_s9  ;;  %p614_p9 = scmp.lt.u32.totalorder %s610_s9, %s840_s0 }
  0x19   :  { %p616_p10 = pnand %p614_p9, %p611_p8 }
  0x1b   :  { %619 = shalt.err (!%p616_p10)
}
  0x1c   :  { %s620_s1 = scalar_lea.vmem %s20_s30, 128  ;;  %p625_p12 = scmp.lt.s32.totalorder %s20_s30, %s20_s30 }
  0x1d   :  { %p621_p11 = scmp.ne.s32.totalorder %s20_s30, %s620_s1  ;;  %p626_p13 = scmp.lt.s32.totalorder %s620_s1, %s620_s1 }
  0x1f   :  { %p627_p0 = por %p626_p13, %p625_p12 }
  0x21   :  { %p628_p1 = pnand %p627_p0, %p621_p11 }
  0x23   :  { %631 = shalt.err (!%p628_p1)
}
  0x24   :  { %22 = dma.hbm_to_vmem [thread:$0]  %s840_s0, 128, %s20_s30, [#allocation3]  }
  0x25   :  { %s632_s18 = scalar_lea.hbm %s842_s2, 2048 }
  0x26   :  { %p633_p2 = scmp.ne.s32.totalorder %s842_s2, %s632_s18  ;;  %p636_p3 = scmp.lt.u32.totalorder %s632_s18, %s842_s2 }
  0x28   :  { %p638_p4 = pnand %p636_p3, %p633_p2 }
  0x2a   :  { %641 = shalt.err (!%p638_p4)
}
  0x2b   :  { %s642_s23 = scalar_lea.vmem %s41_s6, 2048  ;;  %p647_p6 = scmp.lt.s32.totalorder %s41_s6, %s41_s6 }
  0x2c   :  { %p643_p5 = scmp.ne.s32.totalorder %s41_s6, %s642_s23  ;;  %p648_p7 = scmp.lt.s32.totalorder %s642_s23, %s642_s23 }
  0x2e   :  { %p649_p8 = por %p648_p7, %p647_p6 }
  0x30   :  { %p650_p9 = pnand %p649_p8, %p643_p5 }
  0x32   :  { %653 = shalt.err (!%p650_p9)
}
  0x33   :  { %46 = dma.hbm_to_vmem [thread:$0]  %s842_s2, 2048, %s41_s6, [#allocation6], %s707_s25, %s707_s25, %s708_s26  }
  0x34   :  { %s711_s27 = smov [#allocation8]   ;;  %s654_s5 = scalar_lea.hbm %s843_s3, 2048 }
  0x35   :  { %s52_s28 = sshll.u32 %s711_s27, 4  ;;  %p655_p10 = scmp.ne.s32.totalorder %s843_s3, %s654_s5  ;;  %s53_s28 = int_to_ptr.vmem [resolvable:$true] %s52_s28 }
  0x36   :  { %p658_p11 = scmp.lt.u32.totalorder %s654_s5, %s843_s3 }
  0x38   :  { %p660_p12 = pnand %p658_p11, %p655_p10 }
  0x3a   :  { %663 = shalt.err (!%p660_p12)
}
  0x3b   :  { %s664_s11 = scalar_lea.vmem %s53_s28, 2048  ;;  %p669_p0 = scmp.lt.s32.totalorder %s53_s28, %s53_s28 }
  0x3c   :  { %p665_p13 = scmp.ne.s32.totalorder %s53_s28, %s664_s11  ;;  %p670_p1 = scmp.lt.s32.totalorder %s664_s11, %s664_s11 }
  0x3e   :  { %p671_p2 = por %p670_p1, %p669_p0 }
  0x40   :  { %p672_p3 = pnand %p671_p2, %p665_p13 }
  0x42   :  { %675 = shalt.err (!%p672_p3)
}
  0x43   :  { %58 = dma.hbm_to_vmem [thread:$0]  %s843_s3, 2048, %s53_s28, [#allocation9], %s707_s25, %s707_s25, %s708_s26  }
  0x44   :  { %698 = dma.done.wait [#allocation3], 128  }
  0x45   :  { %699 = vsyncadd [#allocation3], 4294967168 }
  0x46   :  { %700 = dma.done.wait [#allocation6], 4096  }
  0x47   :  { %701 = vsyncadd [#allocation6], 4294963200 }
  0x48   :  { %702 = dma.done.wait [#allocation9], 2048  }
  0x49   :  { %703 = vsyncadd [#allocation9], 4294965248  ;;  %v712_v0 = vmov 0.0|0.0   ;;  %vm713_vm0 = vmmov 0   ;;  %v714_v1 = vmov 0.0   ;;  %v72_v2 = vld [vmem:[#allocation5] sm:$0xff] }
  0x4a   :  { %506 = vmatprep.subr.bf16.mxu0 %v712_v0  ;;  %433 = vmatprep.mubr.msk.f32.mxu0 %vm713_vm0, %v714_v1  ;;  %v73_v3 = vld [vmem:[#allocation5 + $0x8] sm:$0xff]  ;;  %v74_v4 = vld [vmem:[#allocation5 + $0x10] sm:$0xff]  ;;  %v75_v6 = vld [vmem:[#allocation5 + $0x18] sm:$0xff]  ;;  %s715_s3 = smov [#allocation10]  }
  0x4b   :  { %530 = vmatprep.subr.bf16.mxu1 %v712_v0  ;;  %468 = vmatprep.mubr.msk.f32.mxu1 %vm713_vm0, %v714_v1  ;;  %v507_v5 = vpack.c.bf16 %v73_v3, %v72_v2  ;;  %v510_v7 = vpack.c.bf16 %v75_v6, %v74_v4  ;;  %v76_v8 = vld [vmem:[#allocation5 + $0x20] sm:$0xff]  ;;  %v77_v9 = vld [vmem:[#allocation5 + $0x28] sm:$0xff]  ;;  %v161_v12 = vld [vmem:[#allocation7 + $0x10] sm:$0xff]  ;;  %s339_s25 = sshll.u32 %s715_s3, 4  ;;  %s340_s25 = int_to_ptr.vmem [resolvable:$true] %s339_s25 }
  0x4c   :  { %v159_v10 = vld [vmem:[#allocation7] sm:$0xff]  ;;  %v160_v11 = vld [vmem:[#allocation7 + $0x8] sm:$0xff]  ;;  %v162_v13 = vld [vmem:[#allocation7 + $0x18] sm:$0xff]  ;;  %v513_v14 = vpack.c.bf16 %v77_v9, %v76_v8  ;;  %s676_s26 = scalar_lea.vmem %s340_s25, 128  ;;  %p681_p5 = scmp.lt.s32.totalorder %s340_s25, %s340_s25 }
  0x4d   :  { %508 = vmatpush3.bf16.msra.mxu0 %v507_v5  ;;  %v531_v15 = vpack.c.bf16 %v160_v11, %v159_v10  ;;  %v78_v16 = vld [vmem:[#allocation5 + $0x30] sm:$0xff]  ;;  %v79_v17 = vld [vmem:[#allocation5 + $0x38] sm:$0xff]  ;;  %v534_v18 = vpack.c.bf16 %v162_v13, %v161_v12  ;;  %v163_v19 = vld [vmem:[#allocation7 + $0x20] sm:$0xff]  ;;  %p677_p4 = scmp.ne.s32.totalorder %s340_s25, %s676_s26  ;;  %p682_p6 = scmp.lt.s32.totalorder %s676_s26, %s676_s26 }
  0x4e   :  { %509 = vmatprep.subr.bf16.mxu0 %v712_v0  ;;  %v164_v20 = vld [vmem:[#allocation7 + $0x28] sm:$0xff]  ;;  %v516_v21 = vpack.c.bf16 %v79_v17, %v78_v16  ;;  %v80_v22 = vld [vmem:[#allocation5 + $0x40] sm:$0xff]  ;;  %v165_v25 = vld [vmem:[#allocation7 + $0x30] sm:$0xff] }
  0x4f   :  { %532 = vmatpush3.bf16.msra.mxu1 %v531_v15  ;;  %v81_v23 = vld [vmem:[#allocation5 + $0x48] sm:$0xff]  ;;  %v537_v24 = vpack.c.bf16 %v164_v20, %v163_v19  ;;  %v166_v26 = vld [vmem:[#allocation7 + $0x38] sm:$0xff]  ;;  %v82_v28 = vld [vmem:[#allocation5 + $0x50] sm:$0xff]  ;;  %p683_p7 = por %p682_p6, %p681_p5 }
  0x50   :  { %533 = vmatprep.subr.bf16.mxu1 %v712_v0  ;;  %v519_v27 = vpack.c.bf16 %v81_v23, %v80_v22  ;;  %v83_v29 = vld [vmem:[#allocation5 + $0x58] sm:$0xff]  ;;  %v540_v30 = vpack.c.bf16 %v166_v26, %v165_v25  ;;  %v167_v31 = vld [vmem:[#allocation7 + $0x40] sm:$0xff]  ;;  %v168_v32 = vld [vmem:[#allocation7 + $0x48] sm:$0xff] }
  0x51   :  { %511 = vmatpush3.bf16.msra.mxu0 %v510_v7  ;;  %v522_v33 = vpack.c.bf16 %v83_v29, %v82_v28  ;;  %v84_v34 = vld [vmem:[#allocation5 + $0x60] sm:$0xff]  ;;  %v85_v35 = vld [vmem:[#allocation5 + $0x68] sm:$0xff]  ;;  %v543_v36 = vpack.c.bf16 %v168_v32, %v167_v31  ;;  %v169_v37 = vld [vmem:[#allocation7 + $0x50] sm:$0xff]  ;;  %p684_p8 = pnand %p683_p7, %p677_p4 }
  0x52   :  { %512 = vmatprep.subr.bf16.mxu0 %v712_v0  ;;  %v170_v38 = vld [vmem:[#allocation7 + $0x58] sm:$0xff]  ;;  %v525_v39 = vpack.c.bf16 %v85_v35, %v84_v34  ;;  %v86_v40 = vld [vmem:[#allocation5 + $0x70] sm:$0xff]  ;;  %v171_v43 = vld [vmem:[#allocation7 + $0x60] sm:$0xff] }
  0x53   :  { %535 = vmatpush3.bf16.msra.mxu1 %v534_v18  ;;  %v87_v41 = vld [vmem:[#allocation5 + $0x78] sm:$0xff]  ;;  %v546_v42 = vpack.c.bf16 %v170_v38, %v169_v37  ;;  %v172_v44 = vld [vmem:[#allocation7 + $0x68] sm:$0xff]  ;;  %v173_v48 = vld [vmem:[#allocation7 + $0x70] sm:$0xff] }
  0x54   :  { %536 = vmatprep.subr.bf16.mxu1 %v712_v0  ;;  %v528_v45 = vpack.c.bf16 %v87_v41, %v86_v40  ;;  %v549_v46 = vpack.c.bf16 %v172_v44, %v171_v43  ;;  %v71_v47 = vld [vmem:[#allocation2] sm:$0xff]  ;;  %v246_v51 = vld [vmem:[#allocation8] sm:$0xff]  ;;  %v247_v52 = vld [vmem:[#allocation8 + $0x8] sm:$0xff] }
  0x55   :  { %514 = vmatpush3.bf16.msra.mxu0 %v513_v14  ;;  %v174_v49 = vld [vmem:[#allocation7 + $0x78] sm:$0xff]  ;;  %v248_v53 = vld [vmem:[#allocation8 + $0x10] sm:$0xff]  ;;  %v555_v54 = vpack.c.bf16 %v247_v52, %v246_v51  ;;  %v250_v57 = vld [vmem:[#allocation8 + $0x20] sm:$0xff] }
  0x56   :  { %515 = vmatprep.subr.bf16.mxu0 %v712_v0  ;;  %v552_v50 = vpack.c.bf16 %v174_v49, %v173_v48  ;;  %v249_v55 = vld [vmem:[#allocation8 + $0x18] sm:$0xff]  ;;  %v251_v58 = vld [vmem:[#allocation8 + $0x28] sm:$0xff]  ;;  %v252_v60 = vld [vmem:[#allocation8 + $0x30] sm:$0xff] }
  0x57   :  { %538 = vmatpush3.bf16.msra.mxu1 %v537_v24  ;;  %v558_v56 = vpack.c.bf16 %v249_v55, %v248_v53  ;;  %v561_v59 = vpack.c.bf16 %v251_v58, %v250_v57  ;;  %v253_v61 = vld [vmem:[#allocation8 + $0x38] sm:$0xff]  ;;  %v254_v63 = vld [vmem:[#allocation8 + $0x40] sm:$0xff]  ;;  %v256_v3 = vld [vmem:[#allocation8 + $0x50] sm:$0xff] }
  0x58   :  { %539 = vmatprep.subr.bf16.mxu1 %v712_v0  ;;  %v564_v62 = vpack.c.bf16 %v253_v61, %v252_v60  ;;  %v257_v4 = vld [vmem:[#allocation8 + $0x58] sm:$0xff]  ;;  %v258_v6 = vld [vmem:[#allocation8 + $0x60] sm:$0xff]  ;;  %v259_v7 = vld [vmem:[#allocation8 + $0x68] sm:$0xff] }
  0x59   :  { %517 = vmatpush3.bf16.msra.mxu0 %v516_v21  ;;  %v570_v5 = vpack.c.bf16 %v257_v4, %v256_v3  ;;  %v573_v8 = vpack.c.bf16 %v259_v7, %v258_v6  ;;  %v260_v12 = vld [vmem:[#allocation8 + $0x70] sm:$0xff]  ;;  %v261_v13 = vld [vmem:[#allocation8 + $0x78] sm:$0xff] }
  0x5a   :  { %518 = vmatprep.subr.bf16.mxu0 %v712_v0  ;;  %v576_v14 = vpack.c.bf16 %v261_v13, %v260_v12 }
  0x5b   :  { %541 = vmatpush3.bf16.msra.mxu1 %v540_v30 }
  0x5c   :  { %542 = vmatprep.subr.bf16.mxu1 %v712_v0 }
  0x5d   :  { %520 = vmatpush3.bf16.msra.mxu0 %v519_v27 }
  0x5e   :  { %521 = vmatprep.subr.bf16.mxu0 %v712_v0 }
  0x5f   :  { %544 = vmatpush3.bf16.msra.mxu1 %v543_v36 }
  0x60   :  { %545 = vmatprep.subr.bf16.mxu1 %v712_v0 }
  0x61   :  { %523 = vmatpush3.bf16.msra.mxu0 %v522_v33 }
  0x62   :  { %524 = vmatprep.subr.bf16.mxu0 %v712_v0 }
  0x63   :  { %547 = vmatpush3.bf16.msra.mxu1 %v546_v42 }
  0x64   :  { %548 = vmatprep.subr.bf16.mxu1 %v712_v0 }
  0x65   :  { %526 = vmatpush3.bf16.msra.mxu0 %v525_v39 }
  0x66   :  { %527 = vmatprep.subr.bf16.mxu0 %v712_v0 }
  0x67   :  { %550 = vmatpush3.bf16.msra.mxu1 %v549_v46 }
  0x68   :  { %551 = vmatprep.subr.bf16.mxu1 %v712_v0 }
  0x69   :  { %529 = vmatpush3.bf16.msra.mxu0 %v528_v45 }
  0x6a   :  { %554 = vmatprep.subr.bf16.mxu0 %v712_v0 }
  0x6b   :  { %553 = vmatpush3.bf16.msra.mxu1 %v552_v50 }
  0x6c   :  { %434 = vmatmul.mubr.f32.vlgmr.msra.gmra.mrb[0].mxu0 %v71_v47 }
  0x6d   :  { %503 = vmatprep.mubr.msk.f32.mxu0 %vm713_vm0, %v714_v1  ;;  %556 = vmatpush3.bf16.msra.mxu0 %v555_v54  ;;  %v255_v1 = vld [vmem:[#allocation8 + $0x48] sm:$0xff] }
  0x6e   :  { %557 = vmatprep.subr.bf16.mxu0 %v712_v0  ;;  %v567_v2 = vpack.c.bf16 %v255_v1, %v254_v63 }
  0x71   :  { %559 = vmatpush3.bf16.msra.mxu0 %v558_v56 }
  0x72   :  { %560 = vmatprep.subr.bf16.mxu0 %v712_v0 }
  0x75   :  { %562 = vmatpush3.bf16.msra.mxu0 %v561_v59 }
  0x76   :  { %563 = vmatprep.subr.bf16.mxu0 %v712_v0 }
  0x79   :  { %565 = vmatpush3.bf16.msra.mxu0 %v564_v62 }
  0x7a   :  { %566 = vmatprep.subr.bf16.mxu0 %v712_v0 }
  0x7d   :  { %568 = vmatpush3.bf16.msra.mxu0 %v567_v2 }
  0x7e   :  { %569 = vmatprep.subr.bf16.mxu0 %v712_v0 }
  0x81   :  { %571 = vmatpush3.bf16.msra.mxu0 %v570_v5 }
  0x82   :  { %572 = vmatprep.subr.bf16.mxu0 %v712_v0 }
  0x85   :  { %574 = vmatpush3.bf16.msra.mxu0 %v573_v8 }
  0x86   :  { %575 = vmatprep.subr.bf16.mxu0 %v712_v0 }
  0x89   :  { %577 = vmatpush3.bf16.msra.mxu0 %v576_v14 }
 0x13f   :  { %v154_v9 = vpop.f32.mrb[0].mxu0 }
 0x140   :  { %v158_v10 = vmax.f32 %v154_v9, 0.0  ;;  %v435_v11 = vpop.f32.mrb[1].mxu0 }
 0x142   :  { %469 = vmatmul.mubr.f32.vlgmr.msra.gmra.mrb[0].mxu1 %v158_v10 }
 0x215   :  { %v241_v15 = vpop.f32.mrb[0].mxu1 }
 0x216   :  { %v245_v16 = vmax.f32 %v241_v15, 0.0  ;;  %v470_v17 = vpop.f32.mrb[1].mxu1 }
 0x218   :  { %504 = vmatmul.mubr.f32.vlgmr.msra.gmra.mrb[2].mxu0 %v245_v16 }
 0x2eb   :  { %v328_v18 = vpop.f32.mrb[2].mxu0 }
 0x2ec   :  { %332 = vst [vmem:[#allocation10] sm:$0xff] %v328_v18  ;;  %v505_v19 = vpop.f32.mrb[3].mxu0 }
 0x2ed   :  { %687 = shalt.err (!%p684_p8)
}
 0x2ee   :  { %s688_s1 = scalar_lea.hbm %s844_s4, 128 }
 0x2ef   :  { %p689_p9 = scmp.ne.s32.totalorder %s844_s4, %s688_s1  ;;  %p692_p10 = scmp.lt.u32.totalorder %s688_s1, %s844_s4 }
 0x2f1   :  { %p694_p11 = pnand %p692_p10, %p689_p9 }
 0x2f3   :  { %697 = shalt.err (!%p694_p11)
}
 0x2f4   :  { %342 = dma.vmem_to_hbm [thread:$0]  %s340_s25, 128, %s844_s4, [#allocation4]  }
 0x2f5   :  { %704 = dma.done.wait [#allocation4], 128  }
 0x2f6   :  { %705 = vsyncadd [#allocation4], 4294967168 }
 0x2f7   :  { %346 = vsyncpa [#allocation3], 1 }
 0x2f8   :  { %347 = vsyncpa [#allocation6], 1 }
 0x2f9   :  { %348 = vsyncpa [#allocation9], 1 }
 0x2fa   :  { %349 = vsyncpa [#allocation4], 1 }

// kernel: tpu_custom_call.1
= control target key start
LH: loop header
LB: loop body
LE: loop exit
PB: predicated region body
PF: predicated region fallthrough
CT: control target
= control target key end

     0   :  { %9 = vsyncpa [#allocation3], 0  ;;  %s840_s0 = inlined_call_operand.hbm [shape: f32[8,128], index: 0, kind: input, shape index: {}]   ;;  %s841_s1 = inlined_call_operand.hbm [shape: f32[128,128], index: 1, kind: input, shape index: {}]   ;;  %s842_s2 = inlined_call_operand.hbm [shape: f32[128,128], index: 2, kind: input, shape index: {}]   ;;  %s843_s3 = inlined_call_operand.hbm [shape: f32[128,128], index: 3, kind: input, shape index: {}]   ;;  %s844_s4 = inlined_call_operand.hbm [shape: f32[8,128], index: 4, kind: output, shape index: {}]  }
   0x1   :  { %10 = vsyncpa [#allocation6], 0 }
   0x2   :  { %11 = vsyncpa [#allocation9], 0 }
   0x3   :  { %12 = vsyncpa [#allocation4], 0  ;;  %s706_s15 = smov [#allocation5]   ;;  %s588_s19 = scalar_lea.hbm %s841_s1, 2048 }
   0x4   :  { %s28_s16 = sshll.u32 %s706_s15, 4  ;;  %p589_p0 = scmp.ne.s32.totalorder %s841_s1, %s588_s19  ;;  %s29_s16 = int_to_ptr.vmem [resolvable:$true] %s28_s16 }
   0x5   :  { %p592_p1 = scmp.lt.u32.totalorder %s588_s19, %s841_s1 }
   0x7   :  { %p594_p2 = pnand %p592_p1, %p589_p0 }
   0x9   :  { %597 = shalt.err (!%p594_p2)
}
   0xa   :  { %s598_s24 = scalar_lea.vmem %s29_s16, 2048  ;;  %p603_p4 = scmp.lt.s32.totalorder %s29_s16, %s29_s16 }
   0xb   :  { %p599_p3 = scmp.ne.s32.totalorder %s29_s16, %s598_s24  ;;  %p604_p5 = scmp.lt.s32.totalorder %s598_s24, %s598_s24 }
   0xd   :  { %p605_p6 = por %p604_p5, %p603_p4 }
   0xf   :  { %p606_p7 = pnand %p605_p6, %p599_p3 }
  0x11   :  { %609 = shalt.err (!%p606_p7)
}
  0x12   :  { %s707_s25 = smov 128   ;;  %s708_s26 = smov 8  }
  0x13   :  { %34 = dma.hbm_to_vmem [thread:$0]  %s841_s1, 2048, %s29_s16, [#allocation6], %s707_s25, %s707_s25, %s708_s26  }
  0x14   :  { %s709_s29 = smov [#allocation2]   ;;  %s710_s5 = smov [#allocation7]  }
  0x15   :  { %s19_s30 = sshll.u32 %s709_s29, 4  ;;  %s40_s6 = sshll.u32 %s710_s5, 4  ;;  %s20_s30 = int_to_ptr.vmem [resolvable:$true] %s19_s30  ;;  %s41_s6 = int_to_ptr.vmem [resolvable:$true] %s40_s6 }
  0x16   :  { %s610_s9 = scalar_lea.hbm %s840_s0, 128 }
  0x17   :  { %p611_p8 = scmp.ne.s32.totalorder %s840_s0, %s610_s9  ;;  %p614_p9 = scmp.lt.u32.totalorder %s610_s9, %s840_s0 }
  0x19   :  { %p616_p10 = pnand %p614_p9, %p611_p8 }
  0x1b   :  { %619 = shalt.err (!%p616_p10)
}
  0x1c   :  { %s620_s1 = scalar_lea.vmem %s20_s30, 128  ;;  %p625_p12 = scmp.lt.s32.totalorder %s20_s30, %s20_s30 }
  0x1d   :  { %p621_p11 = scmp.ne.s32.totalorder %s20_s30, %s620_s1  ;;  %p626_p13 = scmp.lt.s32.totalorder %s620_s1, %s620_s1 }
  0x1f   :  { %p627_p0 = por %p626_p13, %p625_p12 }
  0x21   :  { %p628_p1 = pnand %p627_p0, %p621_p11 }
  0x23   :  { %631 = shalt.err (!%p628_p1)
}
  0x24   :  { %22 = dma.hbm_to_vmem [thread:$0]  %s840_s0, 128, %s20_s30, [#allocation3]  }
  0x25   :  { %s632_s18 = scalar_lea.hbm %s842_s2, 2048 }
  0x26   :  { %p633_p2 = scmp.ne.s32.totalorder %s842_s2, %s632_s18  ;;  %p636_p3 = scmp.lt.u32.totalorder %s632_s18, %s842_s2 }
  0x28   :  { %p638_p4 = pnand %p636_p3, %p633_p2 }
  0x2a   :  { %641 = shalt.err (!%p638_p4)
}
  0x2b   :  { %s642_s23 = scalar_lea.vmem %s41_s6, 2048  ;;  %p647_p6 = scmp.lt.s32.totalorder %s41_s6, %s41_s6 }
  0x2c   :  { %p643_p5 = scmp.ne.s32.totalorder %s41_s6, %s642_s23  ;;  %p648_p7 = scmp.lt.s32.totalorder %s642_s23, %s642_s23 }
  0x2e   :  { %p649_p8 = por %p648_p7, %p647_p6 }
  0x30   :  { %p650_p9 = pnand %p649_p8, %p643_p5 }
  0x32   :  { %653 = shalt.err (!%p650_p9)
}
  0x33   :  { %46 = dma.hbm_to_vmem [thread:$0]  %s842_s2, 2048, %s41_s6, [#allocation6], %s707_s25, %s707_s25, %s708_s26  }
  0x34   :  { %s711_s27 = smov [#allocation8]   ;;  %s654_s5 = scalar_lea.hbm %s843_s3, 2048 }
  0x35   :  { %s52_s28 = sshll.u32 %s711_s27, 4  ;;  %p655_p10 = scmp.ne.s32.totalorder %s843_s3, %s654_s5  ;;  %s53_s28 = int_to_ptr.vmem [resolvable:$true] %s52_s28 }
  0x36   :  { %p658_p11 = scmp.lt.u32.totalorder %s654_s5, %s843_s3 }
  0x38   :  { %p660_p12 = pnand %p658_p11, %p655_p10 }
  0x3a   :  { %663 = shalt.err (!%p660_p12)
}
  0x3b   :  { %s664_s11 = scalar_lea.vmem %s53_s28, 2048  ;;  %p669_p0 = scmp.lt.s32.totalorder %s53_s28, %s53_s28 }
  0x3c   :  { %p665_p13 = scmp.ne.s32.totalorder %s53_s28, %s664_s11  ;;  %p670_p1 = scmp.lt.s32.totalorder %s664_s11, %s664_s11 }
  0x3e   :  { %p671_p2 = por %p670_p1, %p669_p0 }
  0x40   :  { %p672_p3 = pnand %p671_p2, %p665_p13 }
  0x42   :  { %675 = shalt.err (!%p672_p3)
}
  0x43   :  { %58 = dma.hbm_to_vmem [thread:$0]  %s843_s3, 2048, %s53_s28, [#allocation9], %s707_s25, %s707_s25, %s708_s26  }
  0x44   :  { %698 = dma.done.wait [#allocation3], 128  }
  0x45   :  { %699 = vsyncadd [#allocation3], 4294967168 }
  0x46   :  { %700 = dma.done.wait [#allocation6], 4096  }
  0x47   :  { %701 = vsyncadd [#allocation6], 4294963200 }
  0x48   :  { %702 = dma.done.wait [#allocation9], 2048  }
  0x49   :  { %703 = vsyncadd [#allocation9], 4294965248  ;;  %v712_v0 = vmov 0.0|0.0   ;;  %vm713_vm0 = vmmov 0   ;;  %v714_v1 = vmov 0.0   ;;  %v72_v2 = vld [vmem:[#allocation5] sm:$0xff] }
  0x4a   :  { %506 = vmatprep.subr.bf16.mxu0 %v712_v0  ;;  %433 = vmatprep.mubr.msk.f32.mxu0 %vm713_vm0, %v714_v1  ;;  %v73_v3 = vld [vmem:[#allocation5 + $0x8] sm:$0xff]  ;;  %v74_v4 = vld [vmem:[#allocation5 + $0x10] sm:$0xff]  ;;  %v75_v6 = vld [vmem:[#allocation5 + $0x18] sm:$0xff]  ;;  %s715_s3 = smov [#allocation10]  }
  0x4b   :  { %530 = vmatprep.subr.bf16.mxu1 %v712_v0  ;;  %468 = vmatprep.mubr.msk.f32.mxu1 %vm713_vm0, %v714_v1  ;;  %v507_v5 = vpack.c.bf16 %v73_v3, %v72_v2  ;;  %v510_v7 = vpack.c.bf16 %v75_v6, %v74_v4  ;;  %v76_v8 = vld [vmem:[#allocation5 + $0x20] sm:$0xff]  ;;  %v77_v9 = vld [vmem:[#allocation5 + $0x28] sm:$0xff]  ;;  %v161_v12 = vld [vmem:[#allocation7 + $0x10] sm:$0xff]  ;;  %s339_s25 = sshll.u32 %s715_s3, 4  ;;  %s340_s25 = int_to_ptr.vmem [resolvable:$true] %s339_s25 }
  0x4c   :  { %v159_v10 = vld [vmem:[#allocation7] sm:$0xff]  ;;  %v160_v11 = vld [vmem:[#allocation7 + $0x8] sm:$0xff]  ;;  %v162_v13 = vld [vmem:[#allocation7 + $0x18] sm:$0xff]  ;;  %v513_v14 = vpack.c.bf16 %v77_v9, %v76_v8  ;;  %s676_s26 = scalar_lea.vmem %s340_s25, 128  ;;  %p681_p5 = scmp.lt.s32.totalorder %s340_s25, %s340_s25 }
  0x4d   :  { %508 = vmatpush3.bf16.msra.mxu0 %v507_v5  ;;  %v531_v15 = vpack.c.bf16 %v160_v11, %v159_v10  ;;  %v78_v16 = vld [vmem:[#allocation5 + $0x30] sm:$0xff]  ;;  %v79_v17 = vld [vmem:[#allocation5 + $0x38] sm:$0xff]  ;;  %v534_v18 = vpack.c.bf16 %v162_v13, %v161_v12  ;;  %v163_v19 = vld [vmem:[#allocation7 + $0x20] sm:$0xff]  ;;  %p677_p4 = scmp.ne.s32.totalorder %s340_s25, %s676_s26  ;;  %p682_p6 = scmp.lt.s32.totalorder %s676_s26, %s676_s26 }
  0x4e   :  { %509 = vmatprep.subr.bf16.mxu0 %v712_v0  ;;  %v164_v20 = vld [vmem:[#allocation7 + $0x28] sm:$0xff]  ;;  %v516_v21 = vpack.c.bf16 %v79_v17, %v78_v16  ;;  %v80_v22 = vld [vmem:[#allocation5 + $0x40] sm:$0xff]  ;;  %v165_v25 = vld [vmem:[#allocation7 + $0x30] sm:$0xff] }
  0x4f   :  { %532 = vmatpush3.bf16.msra.mxu1 %v531_v15  ;;  %v81_v23 = vld [vmem:[#allocation5 + $0x48] sm:$0xff]  ;;  %v537_v24 = vpack.c.bf16 %v164_v20, %v163_v19  ;;  %v166_v26 = vld [vmem:[#allocation7 + $0x38] sm:$0xff]  ;;  %v82_v28 = vld [vmem:[#allocation5 + $0x50] sm:$0xff]  ;;  %p683_p7 = por %p682_p6, %p681_p5 }
  0x50   :  { %533 = vmatprep.subr.bf16.mxu1 %v712_v0  ;;  %v519_v27 = vpack.c.bf16 %v81_v23, %v80_v22  ;;  %v83_v29 = vld [vmem:[#allocation5 + $0x58] sm:$0xff]  ;;  %v540_v30 = vpack.c.bf16 %v166_v26, %v165_v25  ;;  %v167_v31 = vld [vmem:[#allocation7 + $0x40] sm:$0xff]  ;;  %v168_v32 = vld [vmem:[#allocation7 + $0x48] sm:$0xff] }
  0x51   :  { %511 = vmatpush3.bf16.msra.mxu0 %v510_v7  ;;  %v522_v33 = vpack.c.bf16 %v83_v29, %v82_v28  ;;  %v84_v34 = vld [vmem:[#allocation5 + $0x60] sm:$0xff]  ;;  %v85_v35 = vld [vmem:[#allocation5 + $0x68] sm:$0xff]  ;;  %v543_v36 = vpack.c.bf16 %v168_v32, %v167_v31  ;;  %v169_v37 = vld [vmem:[#allocation7 + $0x50] sm:$0xff]  ;;  %p684_p8 = pnand %p683_p7, %p677_p4 }
  0x52   :  { %512 = vmatprep.subr.bf16.mxu0 %v712_v0  ;;  %v170_v38 = vld [vmem:[#allocation7 + $0x58] sm:$0xff]  ;;  %v525_v39 = vpack.c.bf16 %v85_v35, %v84_v34  ;;  %v86_v40 = vld [vmem:[#allocation5 + $0x70] sm:$0xff]  ;;  %v171_v43 = vld [vmem:[#allocation7 + $0x60] sm:$0xff] }
  0x53   :  { %535 = vmatpush3.bf16.msra.mxu1 %v534_v18  ;;  %v87_v41 = vld [vmem:[#allocation5 + $0x78] sm:$0xff]  ;;  %v546_v42 = vpack.c.bf16 %v170_v38, %v169_v37  ;;  %v172_v44 = vld [vmem:[#allocation7 + $0x68] sm:$0xff]  ;;  %v173_v48 = vld [vmem:[#allocation7 + $0x70] sm:$0xff] }
  0x54   :  { %536 = vmatprep.subr.bf16.mxu1 %v712_v0  ;;  %v528_v45 = vpack.c.bf16 %v87_v41, %v86_v40  ;;  %v549_v46 = vpack.c.bf16 %v172_v44, %v171_v43  ;;  %v71_v47 = vld [vmem:[#allocation2] sm:$0xff]  ;;  %v246_v51 = vld [vmem:[#allocation8] sm:$0xff]  ;;  %v247_v52 = vld [vmem:[#allocation8 + $0x8] sm:$0xff] }
  0x55   :  { %514 = vmatpush3.bf16.msra.mxu0 %v513_v14  ;;  %v174_v49 = vld [vmem:[#allocation7 + $0x78] sm:$0xff]  ;;  %v248_v53 = vld [vmem:[#allocation8 + $0x10] sm:$0xff]  ;;  %v555_v54 = vpack.c.bf16 %v247_v52, %v246_v51  ;;  %v250_v57 = vld [vmem:[#allocation8 + $0x20] sm:$0xff] }
  0x56   :  { %515 = vmatprep.subr.bf16.mxu0 %v712_v0  ;;  %v552_v50 = vpack.c.bf16 %v174_v49, %v173_v48  ;;  %v249_v55 = vld [vmem:[#allocation8 + $0x18] sm:$0xff]  ;;  %v251_v58 = vld [vmem:[#allocation8 + $0x28] sm:$0xff]  ;;  %v252_v60 = vld [vmem:[#allocation8 + $0x30] sm:$0xff] }
  0x57   :  { %538 = vmatpush3.bf16.msra.mxu1 %v537_v24  ;;  %v558_v56 = vpack.c.bf16 %v249_v55, %v248_v53  ;;  %v561_v59 = vpack.c.bf16 %v251_v58, %v250_v57  ;;  %v253_v61 = vld [vmem:[#allocation8 + $0x38] sm:$0xff]  ;;  %v254_v63 = vld [vmem:[#allocation8 + $0x40] sm:$0xff]  ;;  %v256_v3 = vld [vmem:[#allocation8 + $0x50] sm:$0xff] }
  0x58   :  { %539 = vmatprep.subr.bf16.mxu1 %v712_v0  ;;  %v564_v62 = vpack.c.bf16 %v253_v61, %v252_v60  ;;  %v257_v4 = vld [vmem:[#allocation8 + $0x58] sm:$0xff]  ;;  %v258_v6 = vld [vmem:[#allocation8 + $0x60] sm:$0xff]  ;;  %v259_v7 = vld [vmem:[#allocation8 + $0x68] sm:$0xff] }
  0x59   :  { %517 = vmatpush3.bf16.msra.mxu0 %v516_v21  ;;  %v570_v5 = vpack.c.bf16 %v257_v4, %v256_v3  ;;  %v573_v8 = vpack.c.bf16 %v259_v7, %v258_v6  ;;  %v260_v12 = vld [vmem:[#allocation8 + $0x70] sm:$0xff]  ;;  %v261_v13 = vld [vmem:[#allocation8 + $0x78] sm:$0xff] }
  0x5a   :  { %518 = vmatprep.subr.bf16.mxu0 %v712_v0  ;;  %v576_v14 = vpack.c.bf16 %v261_v13, %v260_v12 }
  0x5b   :  { %541 = vmatpush3.bf16.msra.mxu1 %v540_v30 }
  0x5c   :  { %542 = vmatprep.subr.bf16.mxu1 %v712_v0 }
  0x5d   :  { %520 = vmatpush3.bf16.msra.mxu0 %v519_v27 }
  0x5e   :  { %521 = vmatprep.subr.bf16.mxu0 %v712_v0 }
  0x5f   :  { %544 = vmatpush3.bf16.msra.mxu1 %v543_v36 }
  0x60   :  { %545 = vmatprep.subr.bf16.mxu1 %v712_v0 }
  0x61   :  { %523 = vmatpush3.bf16.msra.mxu0 %v522_v33 }
  0x62   :  { %524 = vmatprep.subr.bf16.mxu0 %v712_v0 }
  0x63   :  { %547 = vmatpush3.bf16.msra.mxu1 %v546_v42 }
  0x64   :  { %548 = vmatprep.subr.bf16.mxu1 %v712_v0 }
  0x65   :  { %526 = vmatpush3.bf16.msra.mxu0 %v525_v39 }
  0x66   :  { %527 = vmatprep.subr.bf16.mxu0 %v712_v0 }
  0x67   :  { %550 = vmatpush3.bf16.msra.mxu1 %v549_v46 }
  0x68   :  { %551 = vmatprep.subr.bf16.mxu1 %v712_v0 }
  0x69   :  { %529 = vmatpush3.bf16.msra.mxu0 %v528_v45 }
  0x6a   :  { %554 = vmatprep.subr.bf16.mxu0 %v712_v0 }
  0x6b   :  { %553 = vmatpush3.bf16.msra.mxu1 %v552_v50 }
  0x6c   :  { %434 = vmatmul.mubr.f32.vlgmr.msra.gmra.mrb[0].mxu0 %v71_v47 }
  0x6d   :  { %503 = vmatprep.mubr.msk.f32.mxu0 %vm713_vm0, %v714_v1  ;;  %556 = vmatpush3.bf16.msra.mxu0 %v555_v54  ;;  %v255_v1 = vld [vmem:[#allocation8 + $0x48] sm:$0xff] }
  0x6e   :  { %557 = vmatprep.subr.bf16.mxu0 %v712_v0  ;;  %v567_v2 = vpack.c.bf16 %v255_v1, %v254_v63 }
  0x71   :  { %559 = vmatpush3.bf16.msra.mxu0 %v558_v56 }
  0x72   :  { %560 = vmatprep.subr.bf16.mxu0 %v712_v0 }
  0x75   :  { %562 = vmatpush3.bf16.msra.mxu0 %v561_v59 }
  0x76   :  { %563 = vmatprep.subr.bf16.mxu0 %v712_v0 }
  0x79   :  { %565 = vmatpush3.bf16.msra.mxu0 %v564_v62 }
  0x7a   :  { %566 = vmatprep.subr.bf16.mxu0 %v712_v0 }
  0x7d   :  { %568 = vmatpush3.bf16.msra.mxu0 %v567_v2 }
  0x7e   :  { %569 = vmatprep.subr.bf16.mxu0 %v712_v0 }
  0x81   :  { %571 = vmatpush3.bf16.msra.mxu0 %v570_v5 }
  0x82   :  { %572 = vmatprep.subr.bf16.mxu0 %v712_v0 }
  0x85   :  { %574 = vmatpush3.bf16.msra.mxu0 %v573_v8 }
  0x86   :  { %575 = vmatprep.subr.bf16.mxu0 %v712_v0 }
  0x89   :  { %577 = vmatpush3.bf16.msra.mxu0 %v576_v14 }
 0x13f   :  { %v154_v9 = vpop.f32.mrb[0].mxu0 }
 0x140   :  { %v158_v10 = vmax.f32 %v154_v9, 0.0  ;;  %v435_v11 = vpop.f32.mrb[1].mxu0 }
 0x142   :  { %469 = vmatmul.mubr.f32.vlgmr.msra.gmra.mrb[0].mxu1 %v158_v10 }
 0x215   :  { %v241_v15 = vpop.f32.mrb[0].mxu1 }
 0x216   :  { %v245_v16 = vmax.f32 %v241_v15, 0.0  ;;  %v470_v17 = vpop.f32.mrb[1].mxu1 }
 0x218   :  { %504 = vmatmul.mubr.f32.vlgmr.msra.gmra.mrb[2].mxu0 %v245_v16 }
 0x2eb   :  { %v328_v18 = vpop.f32.mrb[2].mxu0 }
 0x2ec   :  { %332 = vst [vmem:[#allocation10] sm:$0xff] %v328_v18  ;;  %v505_v19 = vpop.f32.mrb[3].mxu0 }
 0x2ed   :  { %687 = shalt.err (!%p684_p8)
}
 0x2ee   :  { %s688_s1 = scalar_lea.hbm %s844_s4, 128 }
 0x2ef   :  { %p689_p9 = scmp.ne.s32.totalorder %s844_s4, %s688_s1  ;;  %p692_p10 = scmp.lt.u32.totalorder %s688_s1, %s844_s4 }
 0x2f1   :  { %p694_p11 = pnand %p692_p10, %p689_p9 }
 0x2f3   :  { %697 = shalt.err (!%p694_p11)
}
 0x2f4   :  { %342 = dma.vmem_to_hbm [thread:$0]  %s340_s25, 128, %s844_s4, [#allocation4]  }
 0x2f5   :  { %704 = dma.done.wait [#allocation4], 128  }
 0x2f6   :  { %705 = vsyncadd [#allocation4], 4294967168 }
 0x2f7   :  { %346 = vsyncpa [#allocation3], 1 }
 0x2f8   :  { %347 = vsyncpa [#allocation6], 1 }
 0x2f9   :  { %348 = vsyncpa [#allocation9], 1 }
 0x2fa   :  { %349 = vsyncpa [#allocation4], 1 }

</bundles_post_ra>
